<compile_context>
chip_gen: v6e
topology: v6e:2x2x1
jax: 0.10.0
libtpu: 0.0.40
codegen_flags: <defaults>
</compile_context>

<pallas_src>
import jax
import jax.numpy as jnp
from jax.experimental import pallas as pl
from jax.experimental.pallas import tpu as pltpu


def basic_block_kernel(x_ref, t1_ref, b1_ref, t2_ref, b2_ref, out_ref, pad_ref):
    # x_ref  : (Nb, H, W*C)   f32 lane-dense input slab
    # t*_ref : (3, W*C, W*C)  bf16 block-Toeplitz conv weights (BN scale folded)
    # b*_ref : (1, W*C)       f32 folded BN bias (tiled along W)
    # out_ref: (Nb, H, W*C)   f32 lane-dense output slab
    # pad_ref: (Nb, H+2, W*C) bf16 scratch; rows 0 and H+1 are the zero halo
    Nb, H, WC = x_ref.shape
    M = Nb * H
    mxu_dtype = pad_ref.dtype

    # Zero only the two halo rows (full-lane-width stores).  Re-zeroed every
    # step so iterations are independent under the "parallel" grid axis.
    zero_row = jnp.zeros((Nb, 1, WC), mxu_dtype)
    pad_ref[:, 0:1, :] = zero_row
    pad_ref[:, H + 1:H + 2, :] = zero_row

    def conv3x3(t_ref):
        # One (M, W*C) x (W*C, W*C) MXU matmul per kernel row dy, accumulated
        # in f32.  No im2col patch is ever materialized; operands are bf16.
        acc = jnp.zeros((M, WC), jnp.float32)
        for dy in range(3):
            lhs = pad_ref[:, dy:dy + H, :].reshape(M, WC)
            acc += jnp.dot(lhs, t_ref[dy], preferred_element_type=jnp.float32)
        return acc

    # ---- conv1 (+ BN1 scale pre-folded into t1) + bias + ReLU ----
    pad_ref[:, 1:H + 1, :] = x_ref[...].astype(mxu_dtype)
    out1 = jnp.maximum(conv3x3(t1_ref) + b1_ref[...], 0.0)            # (M, WC) f32

    # ---- conv2 (+ BN2) + residual add (re-read x_ref) + ReLU ----
    pad_ref[:, 1:H + 1, :] = out1.reshape(Nb, H, WC).astype(mxu_dtype)
    out2 = conv3x3(t2_ref) + b2_ref[...]                               # (M, WC) f32
    res = jnp.maximum(out2 + x_ref[...].astype(jnp.float32).reshape(M, WC), 0.0)
    out_ref[...] = res.reshape(Nb, H, WC).astype(out_ref.dtype)


def build_row_toeplitz(w, W):
    """(3,3,Cin,Cout) HWIO conv weight -> (3, W*Cin, W*Cout) row-Toeplitz.

    T[dy, wi*Cin+ci, wo*Cout+co] = w[dy, wi-wo+1, ci, co] when 0<=wi-wo+1<=2,
    else 0.  Taps that would read W-direction padding are simply dropped, so
    the kernel never needs a column halo.
    """
    KH, KW, Cin, Cout = w.shape
    assert KH == 3 and KW == 3
    wi = jnp.arange(W)[:, None]                 # input column
    wo = jnp.arange(W)[None, :]                 # output column
    dx = wi - wo + 1                            # kernel column tap
    valid = ((dx >= 0) & (dx <= 2)).astype(w.dtype)
    dxc = jnp.clip(dx, 0, 2)
    blocks = w[:, dxc, :, :] * valid[None, :, :, None, None]   # (3, W, W, Cin, Cout)
    return blocks.transpose(0, 1, 3, 2, 4).reshape(3, W * Cin, W * Cout)


def _vmem_bytes_estimate(block_n, H, WC, mxu_bytes):
    io_block = block_n * H * WC * 4                      # one f32 x / out block
    pad = block_n * (H + 2) * WC * mxu_bytes             # scratch
    weights = 2 * (3 * WC * WC * mxu_bytes + WC * 4)     # T1/T2 + biases
    live = 3 * block_n * H * WC * 4                      # acc/out1/out2 temporaries
    return 2 * 2 * io_block + 2 * weights + pad + live   # 2x: double buffering


def basic_block(x, w1, s1, b1, w2, s2, b2, *, block_n=None,
                mxu_dtype=jnp.bfloat16, vmem_budget=20 * 1024 * 1024):
    """Fused BasicBlock forward (stride=1, no downsample).

    x: (N, H, W, Cin) NHWC f32; w1: (3,3,Cin,C), w2: (3,3,C,C) HWIO;
    s*/b*: folded BatchNorm scale/bias per channel.  Returns (N, H, W, C).
    """
    N, H, W, Cin = x.shape
    C = w1.shape[-1]
    assert w1.shape == (3, 3, Cin, C) and w2.shape == (3, 3, C, C)
    # stride=1 / downsample=None => residual is x itself, so Cin must equal C.
    assert Cin == C, "BasicBlock without downsample requires inplanes == planes"
    WC = W * C
    mxu_bytes = jnp.dtype(mxu_dtype).itemsize
    assert 3 * WC * WC * mxu_bytes <= 8 * 1024 * 1024, \
        "row-Toeplitz path is for small W*C (see TODO for large shapes)"

    s1 = jnp.reshape(s1, (C,))
    s2 = jnp.reshape(s2, (C,))
    # Fold BN scale into the conv weights, build block-Toeplitz row weights.
    t1 = build_row_toeplitz(w1 * s1[None, None, None, :], W).astype(mxu_dtype)
    t2 = build_row_toeplitz(w2 * s2[None, None, None, :], W).astype(mxu_dtype)
    b1d = jnp.tile(jnp.reshape(b1, (C,)), W).reshape(1, WC).astype(jnp.float32)
    b2d = jnp.tile(jnp.reshape(b2, (C,)), W).reshape(1, WC).astype(jnp.float32)

    x_slab = x.reshape(N, H, WC)          # metadata-only merge of (W, C) lanes

    if block_n is None:
        # Largest batch tile under the VMEM budget (fewest grid steps; best on
        # single-TC v5e/v6e).
        block_n = 1
        for bn in range(N, 0, -1):
            if N % bn == 0 and _vmem_bytes_estimate(bn, H, WC, mxu_bytes) <= vmem_budget:
                block_n = bn
                break
    assert N % block_n == 0
    est = _vmem_bytes_estimate(block_n, H, WC, mxu_bytes)
    vmem_limit = None if est <= (16 << 20) else int(min(2 * est, 64 << 20))

    flops = 2 * 2 * 3 * (N * H) * WC * WC          # two convs x three row-matmuls
    bytes_accessed = (2 * N * H * WC * 4           # x in + out
                      + 2 * 3 * WC * WC * mxu_bytes
                      + 2 * WC * 4)
    cost = pl.CostEstimate(flops=flops, transcendentals=0,
                           bytes_accessed=bytes_accessed)

    out = pl.pallas_call(
        basic_block_kernel,
        out_shape=jax.ShapeDtypeStruct((N, H, WC), x.dtype),
        grid_spec=pltpu.PrefetchScalarGridSpec(
            num_scalar_prefetch=0,
            grid=(N // block_n,),
            in_specs=[
                pl.BlockSpec((block_n, H, WC), lambda n: (n, 0, 0)),
                pl.BlockSpec((3, WC, WC), lambda n: (0, 0, 0)),
                pl.BlockSpec((1, WC), lambda n: (0, 0)),
                pl.BlockSpec((3, WC, WC), lambda n: (0, 0, 0)),
                pl.BlockSpec((1, WC), lambda n: (0, 0)),
            ],
            out_specs=pl.BlockSpec((block_n, H, WC), lambda n: (n, 0, 0)),
            scratch_shapes=[pltpu.VMEM((block_n, H + 2, WC), mxu_dtype)],
        ),
        compiler_params=pltpu.CompilerParams(
            dimension_semantics=("parallel",),   # batch items are independent
            vmem_limit_bytes=vmem_limit),
        cost_estimate=cost,
    )(x_slab, t1, b1d, t2, b2d)
    # Metadata-only reshape back to NHWC.
    return out.reshape(N, H, W, C)


def fold_bn(gamma, beta, mean, var, eps=1e-5):
    scale = gamma / jnp.sqrt(var + eps)
    bias = beta - mean * scale
    return scale, bias


def reference(x, w1, g1, be1, m1, v1, w2, g2, be2, m2, v2, eps=1e-5):
    dn = ('NHWC', 'HWIO', 'NHWC')
    out = jax.lax.conv_general_dilated(x, w1, (1, 1), ((1, 1), (1, 1)),
                                       dimension_numbers=dn)
    out = (out - m1) / jnp.sqrt(v1 + eps) * g1 + be1
    out = jnp.maximum(out, 0.0)
    out = jax.lax.conv_general_dilated(out, w2, (1, 1), ((1, 1), (1, 1)),
                                       dimension_numbers=dn)
    out = (out - m2) / jnp.sqrt(v2 + eps) * g2 + be2
    out = jnp.maximum(out + x, 0.0)
    return out


if __name__ == "__main__":
    # BasicBlock(inplanes=8, planes=8, stride=1); W*C == 128 -> lane-dense rows.
    N, H, W, C = 4, 16, 16, 8
    key = jax.random.PRNGKey(0)
    ks = jax.random.split(key, 11)

    x = jax.random.normal(ks[0], (N, H, W, C), jnp.float32)

    w1 = 0.1 * jax.random.normal(ks[1], (3, 3, C, C), jnp.float32)   # HWIO
    w2 = 0.1 * jax.random.normal(ks[2], (3, 3, C, C), jnp.float32)   # HWIO

    g1 = 1.0 + 0.1 * jax.random.normal(ks[3], (C,), jnp.float32)
    be1 = 0.1 * jax.random.normal(ks[4], (C,), jnp.float32)
    m1 = 0.1 * jax.random.normal(ks[5], (C,), jnp.float32)
    v1 = jnp.abs(1.0 + 0.1 * jax.random.normal(ks[6], (C,), jnp.float32))

    g2 = 1.0 + 0.1 * jax.random.normal(ks[7], (C,), jnp.float32)
    be2 = 0.1 * jax.random.normal(ks[8], (C,), jnp.float32)
    m2 = 0.1 * jax.random.normal(ks[9], (C,), jnp.float32)
    v2 = jnp.abs(1.0 + 0.1 * jax.random.normal(ks[10], (C,), jnp.float32))

    s1, b1 = fold_bn(g1, be1, m1, v1)
    s2, b2 = fold_bn(g2, be2, m2, v2)

    out = basic_block(x, w1, s1, b1, w2, s2, b2)   # block_n heuristic -> grid=(1,)
    jax.block_until_ready(out)

    ref = reference(x, w1, g1, be1, m1, v1, w2, g2, be2, m2, v2)
    assert out.shape == (N, H, W, C)
    # bf16 MXU inputs (f32 accumulate): tolerance loosened vs. pure-f32 path.
    err = float(jnp.max(jnp.abs(out - ref)))
    assert err < 5e-2, f"mismatch vs. JAX reference: {err}"

    print("KERNEL_OK")
</pallas_src>

<mosaic_0001>
module attributes {stable_mosaic.version = 11 : i64} {
  func.func @basic_block_kernel(%arg0: i32, %arg1: memref<4x16x128xf32, #tpu.memory_space<vmem>>, %arg2: memref<3x128x128xbf16, #tpu.memory_space<vmem>>, %arg3: memref<1x128xf32, #tpu.memory_space<vmem>>, %arg4: memref<3x128x128xbf16, #tpu.memory_space<vmem>>, %arg5: memref<1x128xf32, #tpu.memory_space<vmem>>, %arg6: memref<4x16x128xf32, #tpu.memory_space<vmem>>, %arg7: memref<4x18x128xbf16, #tpu.memory_space<vmem>>) attributes {dimension_semantics = [#tpu.dimension_semantics<parallel>], iteration_bounds = array<i64: 1>, scalar_prefetch = 0 : i64, scratch_operands = 1 : i64, tpu.core_type = #tpu.core_type<tc>, window_params = [{transform_indices = @transform_0, window_bounds = array<i64: 4, 16, 128>}, {pipeline_mode = #tpu.pipeline_mode<synchronous>, transform_indices = @transform_1, window_bounds = array<i64: 3, 128, 128>}, {pipeline_mode = #tpu.pipeline_mode<synchronous>, transform_indices = @transform_2, window_bounds = array<i64: 1, 128>}, {pipeline_mode = #tpu.pipeline_mode<synchronous>, transform_indices = @transform_3, window_bounds = array<i64: 3, 128, 128>}, {pipeline_mode = #tpu.pipeline_mode<synchronous>, transform_indices = @transform_4, window_bounds = array<i64: 1, 128>}, {transform_indices = @transform_5, window_bounds = array<i64: 4, 16, 128>}]} {
    %cst = arith.constant 0.000000e+00 : bf16
    %0 = vector.broadcast %cst : bf16 to vector<4x1x128xbf16>
    %c0 = arith.constant 0 : index
    %c0_0 = arith.constant 0 : index
    %c0_1 = arith.constant 0 : index
    %1 = vector.load %arg7[%c0, %c0_0, %c0_1] : memref<4x18x128xbf16, #tpu.memory_space<vmem>>, vector<4x1x128xbf16>
    tpu.vector_store %arg7[%c0, %c0_0, %c0_1], %0 {strides = array<i32>} : memref<4x18x128xbf16, #tpu.memory_space<vmem>>, vector<4x1x128xbf16>,
    %c0_2 = arith.constant 0 : index
    %c17 = arith.constant 17 : index
    %c0_3 = arith.constant 0 : index
    %2 = vector.load %arg7[%c0_2, %c17, %c0_3] : memref<4x18x128xbf16, #tpu.memory_space<vmem>>, vector<4x1x128xbf16>
    tpu.vector_store %arg7[%c0_2, %c17, %c0_3], %0 {strides = array<i32>} : memref<4x18x128xbf16, #tpu.memory_space<vmem>>, vector<4x1x128xbf16>,
    %c0_4 = arith.constant 0 : index
    %c0_5 = arith.constant 0 : index
    %c0_6 = arith.constant 0 : index
    %3 = vector.load %arg1[%c0_4, %c0_5, %c0_6] : memref<4x16x128xf32, #tpu.memory_space<vmem>>, vector<4x16x128xf32>
    %4 = arith.truncf %3 : vector<4x16x128xf32> to vector<4x16x128xbf16>
    %c0_7 = arith.constant 0 : index
    %c1 = arith.constant 1 : index
    %c0_8 = arith.constant 0 : index
    %5 = vector.load %arg7[%c0_7, %c1, %c0_8] : memref<4x18x128xbf16, #tpu.memory_space<vmem>>, vector<4x16x128xbf16>
    tpu.vector_store %arg7[%c0_7, %c1, %c0_8], %4 {strides = array<i32>} : memref<4x18x128xbf16, #tpu.memory_space<vmem>>, vector<4x16x128xbf16>,
    %cst_9 = arith.constant 0.000000e+00 : f32
    %6 = vector.broadcast %cst_9 : f32 to vector<64x128xf32>
    %c0_10 = arith.constant 0 : index
    %c0_11 = arith.constant 0 : index
    %c0_12 = arith.constant 0 : index
    %7 = vector.load %arg7[%c0_10, %c0_11, %c0_12] : memref<4x18x128xbf16, #tpu.memory_space<vmem>>, vector<4x16x128xbf16>
    %8 = vector.shape_cast %7 : vector<4x16x128xbf16> to vector<64x128xbf16>
    %c0_13 = arith.constant 0 : index
    %c0_14 = arith.constant 0 : index
    %c0_15 = arith.constant 0 : index
    %9 = vector.load %arg2[%c0_13, %c0_14, %c0_15] : memref<3x128x128xbf16, #tpu.memory_space<vmem>>, vector<1x128x128xbf16>
    %10 = vector.shape_cast %9 : vector<1x128x128xbf16> to vector<128x128xbf16>
    %cst_16 = arith.constant dense<0.000000e+00> : vector<64x128xf32>
    %11 = tpu.matmul %8, %10, %cst_16 {dimension_numbers = #tpu.dot_dimension_numbers<[1], [0], [0], [1], [0, 0, 1, 1], [], []>} : vector<64x128xbf16>, vector<128x128xbf16>, vector<64x128xf32> -> vector<64x128xf32>
    %12 = arith.addf %6, %11 : vector<64x128xf32>
    %c0_17 = arith.constant 0 : index
    %c1_18 = arith.constant 1 : index
    %c0_19 = arith.constant 0 : index
    %13 = vector.load %arg7[%c0_17, %c1_18, %c0_19] : memref<4x18x128xbf16, #tpu.memory_space<vmem>>, vector<4x16x128xbf16>
    %14 = vector.shape_cast %13 : vector<4x16x128xbf16> to vector<64x128xbf16>
    %c1_20 = arith.constant 1 : index
    %c0_21 = arith.constant 0 : index
    %c0_22 = arith.constant 0 : index
    %15 = vector.load %arg2[%c1_20, %c0_21, %c0_22] : memref<3x128x128xbf16, #tpu.memory_space<vmem>>, vector<1x128x128xbf16>
    %16 = vector.shape_cast %15 : vector<1x128x128xbf16> to vector<128x128xbf16>
    %cst_23 = arith.constant dense<0.000000e+00> : vector<64x128xf32>
    %17 = tpu.matmul %14, %16, %cst_23 {dimension_numbers = #tpu.dot_dimension_numbers<[1], [0], [0], [1], [0, 0, 1, 1], [], []>} : vector<64x128xbf16>, vector<128x128xbf16>, vector<64x128xf32> -> vector<64x128xf32>
    %18 = arith.addf %12, %17 : vector<64x128xf32>
    %c0_24 = arith.constant 0 : index
    %c2 = arith.constant 2 : index
    %c0_25 = arith.constant 0 : index
    %19 = vector.load %arg7[%c0_24, %c2, %c0_25] : memref<4x18x128xbf16, #tpu.memory_space<vmem>>, vector<4x16x128xbf16>
    %20 = vector.shape_cast %19 : vector<4x16x128xbf16> to vector<64x128xbf16>
    %c2_26 = arith.constant 2 : index
    %c0_27 = arith.constant 0 : index
    %c0_28 = arith.constant 0 : index
    %21 = vector.load %arg2[%c2_26, %c0_27, %c0_28] : memref<3x128x128xbf16, #tpu.memory_space<vmem>>, vector<1x128x128xbf16>
    %22 = vector.shape_cast %21 : vector<1x128x128xbf16> to vector<128x128xbf16>
    %cst_29 = arith.constant dense<0.000000e+00> : vector<64x128xf32>
    %23 = tpu.matmul %20, %22, %cst_29 {dimension_numbers = #tpu.dot_dimension_numbers<[1], [0], [0], [1], [0, 0, 1, 1], [], []>} : vector<64x128xbf16>, vector<128x128xbf16>, vector<64x128xf32> -> vector<64x128xf32>
    %24 = arith.addf %18, %23 : vector<64x128xf32>
    %c0_30 = arith.constant 0 : index
    %c0_31 = arith.constant 0 : index
    %25 = vector.load %arg3[%c0_30, %c0_31] : memref<1x128xf32, #tpu.memory_space<vmem>>, vector<1x128xf32>
    %26 = vector.broadcast %25 : vector<1x128xf32> to vector<64x128xf32>
    %27 = arith.addf %24, %26 : vector<64x128xf32>
    %cst_32 = arith.constant 0.000000e+00 : f32
    %28 = vector.broadcast %cst_32 : f32 to vector<64x128xf32>
    %29 = arith.maximumf %27, %28 : vector<64x128xf32>
    %30 = vector.shape_cast %29 : vector<64x128xf32> to vector<4x16x128xf32>
    %31 = arith.truncf %30 : vector<4x16x128xf32> to vector<4x16x128xbf16>
    %c0_33 = arith.constant 0 : index
    %c1_34 = arith.constant 1 : index
    %c0_35 = arith.constant 0 : index
    %32 = vector.load %arg7[%c0_33, %c1_34, %c0_35] : memref<4x18x128xbf16, #tpu.memory_space<vmem>>, vector<4x16x128xbf16>
    tpu.vector_store %arg7[%c0_33, %c1_34, %c0_35], %31 {strides = array<i32>} : memref<4x18x128xbf16, #tpu.memory_space<vmem>>, vector<4x16x128xbf16>,
    %cst_36 = arith.constant 0.000000e+00 : f32
    %33 = vector.broadcast %cst_36 : f32 to vector<64x128xf32>
    %c0_37 = arith.constant 0 : index
    %c0_38 = arith.constant 0 : index
    %c0_39 = arith.constant 0 : index
    %34 = vector.load %arg7[%c0_37, %c0_38, %c0_39] : memref<4x18x128xbf16, #tpu.memory_space<vmem>>, vector<4x16x128xbf16>
    %35 = vector.shape_cast %34 : vector<4x16x128xbf16> to vector<64x128xbf16>
    %c0_40 = arith.constant 0 : index
    %c0_41 = arith.constant 0 : index
    %c0_42 = arith.constant 0 : index
    %36 = vector.load %arg4[%c0_40, %c0_41, %c0_42] : memref<3x128x128xbf16, #tpu.memory_space<vmem>>, vector<1x128x128xbf16>
    %37 = vector.shape_cast %36 : vector<1x128x128xbf16> to vector<128x128xbf16>
    %cst_43 = arith.constant dense<0.000000e+00> : vector<64x128xf32>
    %38 = tpu.matmul %35, %37, %cst_43 {dimension_numbers = #tpu.dot_dimension_numbers<[1], [0], [0], [1], [0, 0, 1, 1], [], []>} : vector<64x128xbf16>, vector<128x128xbf16>, vector<64x128xf32> -> vector<64x128xf32>
    %39 = arith.addf %33, %38 : vector<64x128xf32>
    %c0_44 = arith.constant 0 : index
    %c1_45 = arith.constant 1 : index
    %c0_46 = arith.constant 0 : index
    %40 = vector.load %arg7[%c0_44, %c1_45, %c0_46] : memref<4x18x128xbf16, #tpu.memory_space<vmem>>, vector<4x16x128xbf16>
    %41 = vector.shape_cast %40 : vector<4x16x128xbf16> to vector<64x128xbf16>
    %c1_47 = arith.constant 1 : index
    %c0_48 = arith.constant 0 : index
    %c0_49 = arith.constant 0 : index
    %42 = vector.load %arg4[%c1_47, %c0_48, %c0_49] : memref<3x128x128xbf16, #tpu.memory_space<vmem>>, vector<1x128x128xbf16>
    %43 = vector.shape_cast %42 : vector<1x128x128xbf16> to vector<128x128xbf16>
    %cst_50 = arith.constant dense<0.000000e+00> : vector<64x128xf32>
    %44 = tpu.matmul %41, %43, %cst_50 {dimension_numbers = #tpu.dot_dimension_numbers<[1], [0], [0], [1], [0, 0, 1, 1], [], []>} : vector<64x128xbf16>, vector<128x128xbf16>, vector<64x128xf32> -> vector<64x128xf32>
    %45 = arith.addf %39, %44 : vector<64x128xf32>
    %c0_51 = arith.constant 0 : index
    %c2_52 = arith.constant 2 : index
    %c0_53 = arith.constant 0 : index
    %46 = vector.load %arg7[%c0_51, %c2_52, %c0_53] : memref<4x18x128xbf16, #tpu.memory_space<vmem>>, vector<4x16x128xbf16>
    %47 = vector.shape_cast %46 : vector<4x16x128xbf16> to vector<64x128xbf16>
    %c2_54 = arith.constant 2 : index
    %c0_55 = arith.constant 0 : index
    %c0_56 = arith.constant 0 : index
    %48 = vector.load %arg4[%c2_54, %c0_55, %c0_56] : memref<3x128x128xbf16, #tpu.memory_space<vmem>>, vector<1x128x128xbf16>
    %49 = vector.shape_cast %48 : vector<1x128x128xbf16> to vector<128x128xbf16>
    %cst_57 = arith.constant dense<0.000000e+00> : vector<64x128xf32>
    %50 = tpu.matmul %47, %49, %cst_57 {dimension_numbers = #tpu.dot_dimension_numbers<[1], [0], [0], [1], [0, 0, 1, 1], [], []>} : vector<64x128xbf16>, vector<128x128xbf16>, vector<64x128xf32> -> vector<64x128xf32>
    %51 = arith.addf %45, %50 : vector<64x128xf32>
    %c0_58 = arith.constant 0 : index
    %c0_59 = arith.constant 0 : index
    %52 = vector.load %arg5[%c0_58, %c0_59] : memref<1x128xf32, #tpu.memory_space<vmem>>, vector<1x128xf32>
    %53 = vector.broadcast %52 : vector<1x128xf32> to vector<64x128xf32>
    %54 = arith.addf %51, %53 : vector<64x128xf32>
    %c0_60 = arith.constant 0 : index
    %c0_61 = arith.constant 0 : index
    %c0_62 = arith.constant 0 : index
    %55 = vector.load %arg1[%c0_60, %c0_61, %c0_62] : memref<4x16x128xf32, #tpu.memory_space<vmem>>, vector<4x16x128xf32>
    %56 = vector.shape_cast %55 : vector<4x16x128xf32> to vector<64x128xf32>
    %57 = arith.addf %54, %56 : vector<64x128xf32>
    %cst_63 = arith.constant 0.000000e+00 : f32
    %58 = vector.broadcast %cst_63 : f32 to vector<64x128xf32>
    %59 = arith.maximumf %57, %58 : vector<64x128xf32>
    %60 = vector.shape_cast %59 : vector<64x128xf32> to vector<4x16x128xf32>
    %c0_64 = arith.constant 0 : index
    %c0_65 = arith.constant 0 : index
    %c0_66 = arith.constant 0 : index
    %61 = vector.load %arg6[%c0_64, %c0_65, %c0_66] : memref<4x16x128xf32, #tpu.memory_space<vmem>>, vector<4x16x128xf32>
    tpu.vector_store %arg6[%c0_64, %c0_65, %c0_66], %60 {strides = array<i32>} : memref<4x16x128xf32, #tpu.memory_space<vmem>>, vector<4x16x128xf32>,
    return
  }
  func.func @transform_0(%arg0: i32) -> (i32, i32, i32) {
    %c0_i32 = arith.constant 0 : i32
    %c0_i32_0 = arith.constant 0 : i32
    %c0_i32_1 = arith.constant 0 : i32
    return %arg0, %c0_i32, %c0_i32_0 : i32, i32, i32
  }
  func.func @transform_1(%arg0: i32) -> (i32, i32, i32) {
    %c0_i32 = arith.constant 0 : i32
    %c0_i32_0 = arith.constant 0 : i32
    %c0_i32_1 = arith.constant 0 : i32
    %c0_i32_2 = arith.constant 0 : i32
    return %c0_i32, %c0_i32_0, %c0_i32_1 : i32, i32, i32
  }
  func.func @transform_2(%arg0: i32) -> (i32, i32) {
    %c0_i32 = arith.constant 0 : i32
    %c0_i32_0 = arith.constant 0 : i32
    %c0_i32_1 = arith.constant 0 : i32
    return %c0_i32, %c0_i32_0 : i32, i32
  }
  func.func @transform_3(%arg0: i32) -> (i32, i32, i32) {
    %c0_i32 = arith.constant 0 : i32
    %c0_i32_0 = arith.constant 0 : i32
    %c0_i32_1 = arith.constant 0 : i32
    %c0_i32_2 = arith.constant 0 : i32
    return %c0_i32, %c0_i32_0, %c0_i32_1 : i32, i32, i32
  }
  func.func @transform_4(%arg0: i32) -> (i32, i32) {
    %c0_i32 = arith.constant 0 : i32
    %c0_i32_0 = arith.constant 0 : i32
    %c0_i32_1 = arith.constant 0 : i32
    return %c0_i32, %c0_i32_0 : i32, i32
  }
  func.func @transform_5(%arg0: i32) -> (i32, i32, i32) {
    %c0_i32 = arith.constant 0 : i32
    %c0_i32_0 = arith.constant 0 : i32
    %c0_i32_1 = arith.constant 0 : i32
    return %arg0, %c0_i32, %c0_i32_0 : i32, i32, i32
  }
}

</mosaic_0001>

<bundles_post_ra>
// kernel: tpu_custom_call.1
= control target key start
LH: loop header
LB: loop body
LE: loop exit
PB: predicated region body
PF: predicated region fallthrough
CT: control target
= control target key end

     0   :  { %10 = vsyncpa [#allocation4], 0  ;;  %s2481_s0 = inlined_call_operand.hbm [shape: f32[4,16,128], index: 0, kind: input, shape index: {}]   ;;  %s2482_s1 = inlined_call_operand.hbm [shape: bf16[3,128,128], index: 1, kind: input, shape index: {}]   ;;  %s2483_s2 = inlined_call_operand.vmem [shape: f32[1,128], index: 2, kind: input, shape index: {}]   ;;  %s2484_s3 = inlined_call_operand.hbm [shape: bf16[3,128,128], index: 3, kind: input, shape index: {}]   ;;  %s2485_s4 = inlined_call_operand.vmem [shape: f32[1,128], index: 4, kind: input, shape index: {}]   ;;  %s2486_s5 = inlined_call_operand.hbm [shape: f32[4,16,128], index: 5, kind: output, shape index: {}]  }
   0x1   :  { %11 = vsyncpa [#allocation7], 0 }
   0x2   :  { %12 = vsyncpa [#allocation5], 0  ;;  %s2143_s18 = smov [#allocation6]  }
   0x3   :  { %s30_s19 = sshll.u32 %s2143_s18, 4  ;;  %s31_s19 = int_to_ptr.vmem [resolvable:$true] %s30_s19 }
   0x4   :  { %s2065_s20 = scalar_lea.vmem %s31_s19, 3072  ;;  %p2070_p1 = scmp.lt.s32.totalorder %s31_s19, %s31_s19 }
   0x5   :  { %p2066_p0 = scmp.ne.s32.totalorder %s31_s19, %s2065_s20  ;;  %p2071_p2 = scmp.lt.s32.totalorder %s2065_s20, %s2065_s20 }
   0x7   :  { %p2072_p3 = por %p2071_p2, %p2070_p1 }
   0x9   :  { %p2073_p4 = pnand %p2072_p3, %p2066_p0 }
   0xb   :  { %2076 = shalt.err (!%p2073_p4)
}
   0xc   :  { %s2144_s21 = smov 64   ;;  %s2145_s22 = smov 4  }
   0xd   :  { %36 = dma.hbm_to_vmem [thread:$0]  %s2482_s1, 3072, %s31_s19, [#allocation7], %s2144_s21, %s2144_s21, %s2145_s22  }
   0xe   :  { %s2146_s25 = smov [#allocation3]  }
   0xf   :  { %s18_s26 = sshll.u32 %s2146_s25, 4  ;;  %s19_s26 = int_to_ptr.vmem [resolvable:$true] %s18_s26 }
  0x10   :  { %s2085_s27 = scalar_lea.vmem %s19_s26, 1024  ;;  %p2090_p6 = scmp.lt.s32.totalorder %s19_s26, %s19_s26 }
  0x11   :  { %p2086_p5 = scmp.ne.s32.totalorder %s19_s26, %s2085_s27  ;;  %p2091_p7 = scmp.lt.s32.totalorder %s2085_s27, %s2085_s27 }
  0x13   :  { %p2092_p8 = por %p2091_p7, %p2090_p6 }
  0x15   :  { %p2093_p9 = pnand %p2092_p8, %p2086_p5 }
  0x17   :  { %2096 = shalt.err (!%p2093_p9)
}
  0x18   :  { %s2147_s28 = smov 128   ;;  %s2148_s29 = smov 8  }
  0x19   :  { %24 = dma.hbm_to_vmem [thread:$0]  %s2481_s0, 1024, %s19_s26, [#allocation4], %s2147_s28, %s2147_s28, %s2148_s29  }
  0x1a   :  { %s2149_s1 = smov [#allocation8]  }
  0x1b   :  { %s44_s7 = sshll.u32 %s2149_s1, 4  ;;  %s45_s7 = int_to_ptr.vmem [resolvable:$true] %s44_s7 }
  0x1c   :  { %s2105_s8 = scalar_lea.vmem %s45_s7, 3072  ;;  %p2110_p11 = scmp.lt.s32.totalorder %s45_s7, %s45_s7 }
  0x1d   :  { %p2106_p10 = scmp.ne.s32.totalorder %s45_s7, %s2105_s8  ;;  %p2111_p12 = scmp.lt.s32.totalorder %s2105_s8, %s2105_s8 }
  0x1f   :  { %p2112_p13 = por %p2111_p12, %p2110_p11 }
  0x21   :  { %p2113_p0 = pnand %p2112_p13, %p2106_p10 }
  0x23   :  { %2116 = shalt.err (!%p2113_p0)
}
  0x24   :  { %50 = dma.hbm_to_vmem [thread:$0]  %s2484_s3, 3072, %s45_s7, [#allocation7], %s2144_s21, %s2144_s21, %s2145_s22  }
  0x25   :  { %2137 = dma.done.wait [#allocation4], 1024  }
  0x26   :  { %2138 = vsyncadd [#allocation4], 4294966272 }
  0x27   :  { %2139 = dma.done.wait [#allocation7], 6144  }
  0x28   :  { %2140 = vsyncadd [#allocation7], 4294961152  ;;  %v2001_v0 = vld [vmem:[#allocation6 + $0x78] sm:$0xff]   ;;  %v2003_v2 = vld [vmem:[#allocation6 + $0x70] sm:$0xff]   ;;  %vm63_vm0 = vcmask 1040384   ;;  %vm206_vm6 = vcmask 1043456  }
  0x29   :  { %v2002_v1 = vld [vmem:[#allocation6 + $0x38] sm:$0xff]   ;;  %1849 = vmatprep.subr.bf16.mxu0 %v2001_v0  ;;  %v2004_v3 = vld [vmem:[#allocation6 + $0x30] sm:$0xff]   ;;  %v2005_v4 = vld [vmem:[#allocation6 + $0x68] sm:$0xff]   ;;  %vm64_vm1 = vsmask.f32 256  ;;  %vm658_vm12 = vcmask 1042432  }
  0x2a   :  { %1873 = vmatprep.subr.bf16.mxu1 %v2002_v1  ;;  %1850 = vmatpush3.bf16.msra.mxu0 %v2001_v0  ;;  %v2006_v5 = vld [vmem:[#allocation6 + $0x28] sm:$0xff]   ;;  %vm78_vm2 = vsmask.f32 7938  ;;  %v2007_v6 = vld [vmem:[#allocation6 + $0x60] sm:$0xff]   ;;  %vm2194_vm3 = vmand %vm63_vm0, %vm64_vm1  ;;  %vm124_vm5 = vsmask.f32 4368 }
  0x2b   :  { %1874 = vmatpush3.bf16.msra.mxu1 %v2002_v1  ;;  %1851 = vmatprep.subr.bf16.mxu0 %v2003_v2  ;;  %v2008_v7 = vld [vmem:[#allocation6 + $0x20] sm:$0xff]   ;;  %vm2199_vm4 = vmand %vm63_vm0, %vm78_vm2  ;;  %v2009_v10 = vld [vmem:[#allocation6 + $0x58] sm:$0xff]   ;;  %vm264_vm9 = vsmask.f32 3328  ;;  %vm265_vm10 = vsmask.f32 7440 }
  0x2c   :  { %1875 = vmatprep.subr.bf16.mxu1 %v2004_v3  ;;  %v2010_v11 = vld [vmem:[#allocation6 + $0x18] sm:$0xff]   ;;  %v2011_v12 = vld [vmem:[#allocation6 + $0x50] sm:$0xff]   ;;  %v92_v16 = vld [vmem:[#allocation3] sm:$0xff]  ;;  %vm659_vm13 = vcmask 1046532  }
  0x2d   :  { %v2012_v13 = vld [vmem:[#allocation6 + $0x10] sm:$0xff]   ;;  %v80_v15 = vld [vmem:[#allocation2 + $0x8] sm:$0x1]  ;;  %v93_v19 = vld [vmem:[#allocation3 + $0x8] sm:$0xff]  ;;  %v1761_v20 = vpack.c.bf16 %v92_v16, %v92_v16 }
  0x2e   :  { %1852 = vmatpush3.bf16.msra.mxu0 %v2003_v2  ;;  %v66_v14 = vld [vmem:[#allocation2] sm:$0x1]  ;;  %v81_v18 = vsel %vm2199_vm4, 0, %v80_v15  ;;  %v69_v21 = vld [vmem:[#allocation2 + $0xc] sm:$0x1]  ;;  %v1762_v23 = vpack.c.bf16 %v93_v19, %v93_v19  ;;  %v2013_v28 = vld [vmem:[#allocation6 + $0x48] sm:$0xff]  }
  0x2f   :  { %1876 = vmatpush3.bf16.msra.mxu1 %v2004_v3  ;;  %1853 = vmatprep.subr.bf16.mxu0 %v2005_v4  ;;  %v67_v17 = vsel %vm2194_vm3, 0, %v66_v14  ;;  %v94_v22 = vld [vmem:[#allocation3 + $0x10] sm:$0xff]  ;;  %82 = vst [vmem:[#allocation2 + $0x8] sm:$0x1] %v81_v18  ;;  %v70_v24 = vsel %vm2194_vm3, 0, %v69_v21  ;;  %v95_v26 = vld [vmem:[#allocation3 + $0x18] sm:$0xff]  ;;  %vm2213_vm7 = vmor %vm64_vm1, %vm124_vm5 }
  0x30   :  { %1877 = vmatprep.subr.bf16.mxu1 %v2006_v5  ;;  %68 = vst [vmem:[#allocation2] sm:$0x1] %v67_v17  ;;  %v83_v25 = vld [vmem:[#allocation2 + $0x14] sm:$0x1]  ;;  %v1763_v27 = vpack.c.bf16 %v94_v22, %v94_v22  ;;  %v127_v29 = vshrl.u32 %v1761_v20, 16  ;;  %v130_v30 = vshll.u32 %v1761_v20, 16  ;;  %v1764_v32 = vpack.c.bf16 %v95_v26, %v95_v26  ;;  %vm2219_vm8 = vmand %vm206_vm6, %vm78_vm2 }
  0x31   :  { %71 = vst [vmem:[#allocation2 + $0xc] sm:$0x1] %v70_v24  ;;  %v84_v31 = vsel %vm2199_vm4, 0, %v83_v25  ;;  %v135_v33 = vshrl.u32 %v1762_v23, 16  ;;  %v138_v34 = vshll.u32 %v1762_v23, 16  ;;  %v2014_v37 = vld [vmem:[#allocation6 + $0x8] sm:$0xff]   ;;  %vm2276_vm11 = vmor %vm264_vm9, %vm265_vm10 }
  0x32   :  { %1854 = vmatpush3.bf16.msra.mxu0 %v2005_v4  ;;  %85 = vst [vmem:[#allocation2 + $0x14] sm:$0x1] %v84_v31  ;;  %v144_v35 = vshrl.u32 %v1763_v27, 16  ;;  %v147_v36 = vshll.u32 %v1763_v27, 16  ;;  %v129_v38 = vrot.slane %v127_v29, 7  ;;  %v152_v39 = vshrl.u32 %v1764_v32, 16  ;;  %vm2326_vm14 = vmor %vm658_vm12, %vm659_vm13 }
  0x33   :  { %1878 = vmatpush3.bf16.msra.mxu1 %v2006_v5  ;;  %1855 = vmatprep.subr.bf16.mxu0 %v2007_v6  ;;  %v155_v40 = vshll.u32 %v1764_v32, 16  ;;  %v137_v42 = vrot.slane %v135_v33, 7  ;;  %v2015_v44 = vld [vmem:[#allocation6 + $0x40] sm:$0xff]   ;;  %v2229_v62 = vld [vmem:[#allocation6 + $0xb8] sm:$0xff]   ;;  %v72_v63 = vld [vmem:[#allocation2 + $0x18] sm:$0x1] }
  0x34   :  { %1879 = vmatprep.subr.bf16.mxu1 %v2008_v7  ;;  %v146_v43 = vrot.slane %v144_v35, 7  ;;  %v132_v45 = vor.u32 %v130_v30, %v129_v38  ;;  %v133_v46 = vrot.slane %v129_v38, 4  ;;  %v154_v48 = vrot.slane %v152_v39, 7  ;;  %v2016_v53 = vld [vmem:[#allocation6] sm:$0xff]   ;;  %v86_v4 = vld [vmem:[#allocation2 + $0x20] sm:$0x1] }
  0x35   :  { %v140_v49 = vor.u32 %v138_v34, %v137_v42  ;;  %v142_v50 = vrot.slane %v137_v42, 4  ;;  %v73_v3 = vsel %vm2194_vm3, 0, %v72_v63  ;;  %v96_v5 = vld [vmem:[#allocation3 + $0x20] sm:$0xff]  ;;  %v98_v17 = vld [vmem:[#allocation3 + $0x30] sm:$0xff]  ;;  %v99_v18 = vld [vmem:[#allocation3 + $0x38] sm:$0xff] }
  0x36   :  { %1856 = vmatpush3.bf16.msra.mxu0 %v2007_v6  ;;  %v149_v51 = vor.u32 %v147_v36, %v146_v43  ;;  %v150_v52 = vrot.slane %v146_v43, 4  ;;  %v212_v55 = vld [vmem:[#allocation2 + $0x8] sm:$0x1]  ;;  %v157_v56 = vor.u32 %v155_v40, %v154_v48  ;;  %v159_v57 = vrot.slane %v154_v48, 4  ;;  %74 = vst [vmem:[#allocation2 + $0x18] sm:$0x1] %v73_v3 }
  0x37   :  { %1880 = vmatpush3.bf16.msra.mxu1 %v2008_v7  ;;  %1857 = vmatprep.subr.bf16.mxu0 %v2009_v10  ;;  %v208_v54 = vld [vmem:[#allocation2] sm:$0xf]  ;;  %v141_v58 = vsel %vm2213_vm7, %v133_v46, %v140_v49  ;;  %v213_v60 = vsel %vm2194_vm3, %v142_v50, %v212_v55  ;;  %v87_v7 = vsel %vm2199_vm4, 0, %v86_v4  ;;  %v2245_v20 = vpack.c.bf16 %v98_v17, %v98_v17 }
  0x38   :  { %1881 = vmatprep.subr.bf16.mxu1 %v2010_v11  ;;  %v209_v59 = vsel %vm2219_vm8, %v132_v45, %v208_v54  ;;  %v215_v61 = vld [vmem:[#allocation2 + $0xc] sm:$0xf]  ;;  %211 = vst [vmem:[#allocation2 + $0x4] sm:$0xf] %v141_v58  ;;  %214 = vst [vmem:[#allocation2 + $0x8] sm:$0x1] %v213_v60  ;;  %v158_v0 = vsel %vm2213_vm7, %v150_v52, %v157_v56  ;;  %v2247_v21 = vpack.c.bf16 %v99_v18, %v99_v18 }
  0x39   :  { %210 = vst [vmem:[#allocation2] sm:$0xf] %v209_v59  ;;  %v216_v1 = vsel %vm2219_vm8, %v149_v51, %v215_v61  ;;  %v219_v2 = vld [vmem:[#allocation2 + $0x14] sm:$0x1]  ;;  %218 = vst [vmem:[#allocation2 + $0x10] sm:$0xf] %v158_v0 }
  0x3a   :  { %1858 = vmatpush3.bf16.msra.mxu0 %v2009_v10  ;;  %217 = vst [vmem:[#allocation2 + $0xc] sm:$0xf] %v216_v1  ;;  %v220_v6 = vsel %vm2194_vm3, %v159_v57, %v219_v2  ;;  %v97_v10 = vld [vmem:[#allocation3 + $0x28] sm:$0xff]  ;;  %88 = vst [vmem:[#allocation2 + $0x20] sm:$0x1] %v87_v7  ;;  %v178_v9 = vshrl.u32 %v2245_v20, 16 }
  0x3b   :  { %1882 = vmatpush3.bf16.msra.mxu1 %v2010_v11  ;;  %1859 = vmatprep.subr.bf16.mxu0 %v2011_v12  ;;  %v1765_v11 = vpack.c.bf16 %v96_v5, %v96_v5  ;;  %221 = vst [vmem:[#allocation2 + $0x14] sm:$0x1] %v220_v6  ;;  %v1766_v14 = vpack.c.bf16 %v97_v10, %v97_v10  ;;  %v181_v27 = vshll.u32 %v2245_v20, 16  ;;  %v189_v29 = vshll.u32 %v2247_v21, 16 }
  0x3c   :  { %1883 = vmatprep.subr.bf16.mxu1 %v2012_v13 }
  0x3d   :  { %v161_v19 = vshrl.u32 %v1765_v11, 16  ;;  %v169_v22 = vshrl.u32 %v1766_v14, 16  ;;  %v164_v24 = vshll.u32 %v1765_v11, 16  ;;  %v172_v25 = vshll.u32 %v1766_v14, 16  ;;  %v222_v58 = vld [vmem:[#allocation2 + $0x18] sm:$0xf] }
  0x3e   :  { %1860 = vmatpush3.bf16.msra.mxu0 %v2011_v12  ;;  %v75_v12 = vld [vmem:[#allocation2 + $0x24] sm:$0x1] }
  0x3f   :  { %1884 = vmatpush3.bf16.msra.mxu1 %v2012_v13  ;;  %1861 = vmatprep.subr.bf16.mxu0 %v2013_v28  ;;  %v89_v13 = vld [vmem:[#allocation2 + $0x2c] sm:$0x1]  ;;  %v76_v15 = vsel %vm2194_vm3, 0, %v75_v12  ;;  %v163_v23 = vrot.slane %v161_v19, 7  ;;  %v171_v26 = vrot.slane %v169_v22, 7 }
  0x40   :  { %1885 = vmatprep.subr.bf16.mxu1 %v2014_v37  ;;  %v90_v16 = vsel %vm2199_vm4, 0, %v89_v13  ;;  %77 = vst [vmem:[#allocation2 + $0x24] sm:$0x1] %v76_v15  ;;  %v2254_v30 = vld [vmem:[#allocation2] sm:$0xf] }
  0x41   :  { %91 = vst [vmem:[#allocation2 + $0x2c] sm:$0x1] %v90_v16  ;;  %v2256_v31 = vld [vmem:[#allocation2 + $0x4] sm:$0xf]  ;;  %v2258_v32 = vld [vmem:[#allocation2 + $0x8] sm:$0x1]  ;;  %v174_v0 = vor.u32 %v172_v25, %v171_v26 }
  0x42   :  { %1862 = vmatpush3.bf16.msra.mxu0 %v2013_v28  ;;  %v186_v28 = vshrl.u32 %v2247_v21, 16  ;;  %v268_v33 = vshrl.u32 %v2254_v30, 16  ;;  %v271_v34 = vshll.u32 %v2254_v30, 16  ;;  %v277_v35 = vshll.u32 %v2256_v31, 16  ;;  %v2267_v40 = vld [vmem:[#allocation2 + $0x10] sm:$0xf] }
  0x43   :  { %1886 = vmatpush3.bf16.msra.mxu1 %v2014_v37  ;;  %1863 = vmatprep.subr.bf16.mxu0 %v2015_v44  ;;  %v281_v36 = vshrl.u32 %v2256_v31, 16  ;;  %v238_v37 = vld [vmem:[#allocation2 + $0xc] sm:$0xf]  ;;  %v287_v38 = vshll.u32 %v2258_v32, 16  ;;  %v1683_v39 = vcombine.low %v2254_v30, %v2256_v31  ;;  %v2269_v42 = vld [vmem:[#allocation2 + $0x14] sm:$0x1] }
  0x44   :  { %1887 = vmatprep.subr.bf16.mxu1 %v2016_v53  ;;  %v292_v43 = vshrl.u32 %v238_v37, 16  ;;  %v270_v45 = vrot.slane %v268_v33, 4  ;;  %v273_v46 = vrot.slane %v271_v34, 5  ;;  %v279_v48 = vrot.slane %v277_v35, 5  ;;  %v226_v5 = vld [vmem:[#allocation2 + $0x20] sm:$0x1] }
  0x45   :  { %v283_v49 = vrot.slane %v281_v36, 4  ;;  %v289_v50 = vrot.slane %v287_v38, 5  ;;  %1889 = vmatprep.mubr.bf16.mxu1 %v1683_v39  ;;  %v295_v52 = vshll.u32 %v238_v37, 16  ;;  %v305_v56 = vshrl.u32 %v2267_v40, 16  ;;  %v2020_v38 = vld [vmem:[#allocation6 + $0xb0] sm:$0xff]  }
  0x46   :  { %1864 = vmatpush3.bf16.msra.mxu0 %v2015_v44  ;;  %v166_v44 = vor.u32 %v164_v24, %v163_v23  ;;  %v294_v51 = vrot.slane %v292_v43, 4  ;;  %v274_v54 = vor.u32 %v273_v46, %v270_v45  ;;  %v311_v57 = vshll.u32 %v2269_v42, 16  ;;  %v646_v21 = vld [vmem:[#allocation2] sm:$0xe] }
  0x47   :  { %1888 = vmatpush3.bf16.msra.mxu1 %v2016_v53  ;;  %1897 = vmatprep.subr.bf16.mxu0 %v2229_v62  ;;  %v301_v53 = vshll.u32 %v2267_v40, 16  ;;  %v284_v55 = vor.u32 %v283_v49, %v279_v48  ;;  %v297_v60 = vrot.slane %v295_v52, 5  ;;  %v1684_v63 = vcombine.low %v238_v37, %v2267_v40  ;;  %v229_v12 = vld [vmem:[#allocation2 + $0x24] sm:$0xf] }
  0x48   :  { %v275_v1 = vrot.slane %v274_v54, 4  ;;  %v307_v3 = vrot.slane %v305_v56, 4  ;;  %v313_v4 = vrot.slane %v311_v57, 5  ;;  %v167_v7 = vrot.slane %v163_v23, 4  ;;  %v233_v33 = vld [vmem:[#allocation2 + $0x2c] sm:$0x1] }
  0x49   :  { %v303_v61 = vrot.slane %v301_v53, 5  ;;  %v285_v2 = vrot.slane %v284_v55, 4  ;;  %v298_v6 = vor.u32 %v297_v60, %v294_v51  ;;  %v176_v10 = vrot.slane %v171_v26, 4  ;;  %v2022_v54 = vld [vmem:[#allocation6 + $0xa0] sm:$0xff]  }
  0x4a   :  { %1890 = vmatmul.mubr.bf16.vlgmr.msra.gmra.mxu1 %v1684_v63  ;;  %v223_v11 = vsel %vm2219_vm8, %v166_v44, %v222_v58  ;;  %v280_v13 = vsel %vm2276_vm11, %v275_v1, %v279_v48  ;;  %v180_v16 = vrot.slane %v178_v9, 7  ;;  %v175_v19 = vsel %vm2213_vm7, %v167_v7, %v174_v0  ;;  %v2021_v44 = vld [vmem:[#allocation6 + $0xa8] sm:$0xff]  }
  0x4b   :  { %v290_v14 = vsel %vm2276_vm11, %v285_v2, %v289_v50  ;;  %v308_v15 = vor.u32 %v307_v3, %v303_v61  ;;  %224 = vst [vmem:[#allocation2 + $0x18] sm:$0xf] %v223_v11  ;;  %v299_v18 = vrot.slane %v298_v6, 4  ;;  %v227_v20 = vsel %vm2194_vm3, %v176_v10, %v226_v5  ;;  %225 = vst [vmem:[#allocation2 + $0x1c] sm:$0xf] %v175_v19 }
  0x4c   :  { %v1671_v17 = vcombine.low %v280_v13, %v290_v14  ;;  %228 = vst [vmem:[#allocation2 + $0x20] sm:$0x1] %v227_v20  ;;  %v183_v23 = vor.u32 %v181_v27, %v180_v16  ;;  %v184_v24 = vrot.slane %v180_v16, 4  ;;  %v188_v25 = vrot.slane %v186_v28, 7  ;;  %v1760_v19 = vld [vmem:[%s2485_s4] ss:$0 sm:$0xff] }
  0x4d   :  { %v309_v22 = vrot.slane %v308_v15, 4  ;;  %v304_v26 = vsel %vm2276_vm11, %v299_v18, %v303_v61  ;;  %v663_v48 = vrot.slane %v2256_v31, 5  ;;  %v1695_v60 = vrot.slane %v646_v21, 9  ;;  %v2023_v15 = vld [vmem:[#allocation6 + $0x98] sm:$0xff]   ;;  %s2150_s4 = smov [#allocation9]  }
  0x4e   :  { %1865 = vmatprep.mubr.bf16.mxu0 %v1671_v17  ;;  %v191_v34 = vor.u32 %v189_v29, %v188_v25  ;;  %v193_v35 = vrot.slane %v188_v25, 4  ;;  %v230_v36 = vsel %vm2219_vm8, %v183_v23, %v229_v12  ;;  %v666_v0 = vrot.slane %v2258_v32, 5  ;;  %s1650_s12 = sshll.u32 %s2150_s4, 4  ;;  %s1651_s12 = int_to_ptr.vmem [resolvable:$true] %s1650_s12 }
  0x4f   :  { %v314_v9 = vsel %vm2276_vm11, %v309_v22, %v313_v4  ;;  %231 = vst [vmem:[#allocation2 + $0x24] sm:$0xf] %v230_v36  ;;  %v665_v63 = vrot.slane %v663_v48, 4  ;;  %s2117_s13 = scalar_lea.vmem %s1651_s12, 1024  ;;  %p2122_p2 = scmp.lt.s32.totalorder %s1651_s12, %s1651_s12 }
  0x50   :  { %v1672_v37 = vcombine.low %v304_v26, %v314_v9  ;;  %v192_v27 = vsel %vm2213_vm7, %v184_v24, %v191_v34  ;;  %v234_v28 = vsel %vm2194_vm3, %v193_v35, %v233_v33  ;;  %v2026_v26 = vld [vmem:[#allocation6 + $0x90] sm:$0xff]   ;;  %v664_v33 = vsel %vm2326_vm14, %v1695_v60, %v663_v48  ;;  %v2028_v48 = vld [vmem:[#allocation6 + $0x80] sm:$0xff]   ;;  %p2118_p1 = scmp.ne.s32.totalorder %s1651_s12, %s2117_s13  ;;  %p2123_p3 = scmp.lt.s32.totalorder %s2117_s13, %s2117_s13 }
  0x51   :  { %232 = vst [vmem:[#allocation2 + $0x28] sm:$0xf] %v192_v27  ;;  %235 = vst [vmem:[#allocation2 + $0x2c] sm:$0x1] %v234_v28  ;;  %v667_v9 = vsel %vm2326_vm14, %v665_v63, %v666_v0  ;;  %v670_v34 = vrot.slane %v2267_v40, 5  ;;  %v2027_v27 = vld [vmem:[#allocation6 + $0x88] sm:$0xff]  }
  0x52   :  { %1866 = vmatmul.mubr.bf16.vlgmr.msra.gmra.mxu0 %v1672_v37  ;;  %v240_v39 = vld [vmem:[#allocation2 + $0x18] sm:$0xf]  ;;  %v2304_v45 = vld [vmem:[#allocation2 + $0x1c] sm:$0xf]  ;;  %v1699_v28 = vcombine.low %v664_v33, %v667_v9  ;;  %v673_v40 = vrot.slane %v2269_v42, 5  ;;  %v2029_v63 = vld [vmem:[#allocation8 + $0x38] sm:$0xff]   ;;  %p2124_p4 = por %p2123_p3, %p2122_p2 }
  0x53   :  { %1898 = vmatpush3.bf16.msra.mxu0 %v2229_v62  ;;  %v316_v29 = vshrl.u32 %v240_v39, 16  ;;  %v319_v43 = vshll.u32 %v240_v39, 16  ;;  %v2306_v46 = vld [vmem:[#allocation2 + $0x20] sm:$0x1]  ;;  %v325_v51 = vshll.u32 %v2304_v45, 16  ;;  %v329_v52 = vshrl.u32 %v2304_v45, 16 }
  0x54   :  { %1899 = vmatprep.subr.bf16.mxu0 %v2020_v38  ;;  %v335_v53 = vshll.u32 %v2306_v46, 16  ;;  %v1685_v62 = vcombine.low %v240_v39, %v2304_v45  ;;  %v677_v37 = vrot.slane %v2304_v45, 5  ;;  %v647_v39 = vld [vmem:[#allocation2 + $0xc] sm:$0xe]  ;;  %v2030_v0 = vld [vmem:[#allocation8 + $0x30] sm:$0xff]   ;;  %p2125_p5 = pnand %p2124_p4, %p2118_p1 }
  0x55   :  { %v318_v49 = vrot.slane %v316_v29, 4  ;;  %v321_v50 = vrot.slane %v319_v43, 5  ;;  %v327_v56 = vrot.slane %v325_v51, 5  ;;  %v331_v57 = vrot.slane %v329_v52, 4  ;;  %v648_v29 = vld [vmem:[#allocation2 + $0x18] sm:$0xe] }
  0x56   :  { %v242_v58 = vld [vmem:[#allocation2 + $0x24] sm:$0xf]  ;;  %1893 = vmatprep.mubr.bf16.mxu1 %v1685_v62  ;;  %v337_v3 = vrot.slane %v335_v53, 5  ;;  %v1696_v43 = vrot.slane %v647_v39, 9  ;;  %v1697_v45 = vrot.slane %v648_v29, 9 }
  0x57   :  { %1900 = vmatpush3.bf16.msra.mxu0 %v2020_v38  ;;  %v322_v55 = vor.u32 %v321_v50, %v318_v49  ;;  %v340_v31 = vshrl.u32 %v242_v58, 16  ;;  %v343_v61 = vshll.u32 %v242_v58, 16  ;;  %v332_v2 = vor.u32 %v331_v57, %v327_v56 }
  0x58   :  { %1901 = vmatprep.subr.bf16.mxu0 %v2021_v44  ;;  %v2314_v4 = vld [vmem:[#allocation2 + $0x28] sm:$0xf]  ;;  %v2316_v5 = vld [vmem:[#allocation2 + $0x2c] sm:$0x1]  ;;  %v679_v49 = vrot.slane %v677_v37, 4  ;;  %v680_v50 = vrot.slane %v2306_v46, 5  ;;  %v671_v51 = vsel %vm2326_vm14, %v1696_v43, %v670_v34  ;;  %v678_v42 = vsel %vm2326_vm14, %v1697_v45, %v677_v37 }
  0x59   :  { %v323_v1 = vrot.slane %v322_v55, 4  ;;  %v342_v6 = vrot.slane %v340_v31, 4  ;;  %v345_v7 = vrot.slane %v343_v61, 5  ;;  %v349_v10 = vshll.u32 %v2314_v4, 16 }
  0x5a   :  { %v353_v11 = vshrl.u32 %v2314_v4, 16  ;;  %v333_v13 = vrot.slane %v332_v2, 4  ;;  %v359_v32 = vshll.u32 %v2316_v5, 16  ;;  %v1686_v14 = vcombine.low %v242_v58, %v2314_v4  ;;  %v2032_v2 = vld [vmem:[#allocation8 + $0x28] sm:$0xff]  }
  0x5b   :  { %1902 = vmatpush3.bf16.msra.mxu0 %v2021_v44  ;;  %v328_v12 = vsel %vm2276_vm11, %v323_v1, %v327_v56  ;;  %v346_v16 = vor.u32 %v345_v7, %v342_v6  ;;  %v351_v17 = vrot.slane %v349_v10, 5  ;;  %v672_v44 = vrot.slane %v670_v34, 4  ;;  %v2031_v1 = vld [vmem:[#allocation8 + $0x78] sm:$0xff]   ;;  %v2037_v7 = vld [vmem:[#allocation8 + $0x60] sm:$0xff]   ;;  %v2038_v10 = vld [vmem:[#allocation8 + $0x10] sm:$0xff]  }
  0x5c   :  { %1903 = vmatprep.subr.bf16.mxu0 %v2022_v54  ;;  %v355_v18 = vrot.slane %v353_v11, 4  ;;  %v338_v20 = vsel %vm2276_vm11, %v333_v13, %v337_v3  ;;  %1894 = vmatmul.mubr.bf16.gmra.mxu1 %v1686_v14  ;;  %v361_v25 = vrot.slane %v359_v32, 5  ;;  %v684_v53 = vrot.slane %v2314_v4, 5  ;;  %v2033_v3 = vld [vmem:[#allocation8 + $0x70] sm:$0xff]   ;;  %v2034_v4 = vld [vmem:[#allocation8 + $0x20] sm:$0xff]   ;;  %v2036_v6 = vld [vmem:[#allocation8 + $0x18] sm:$0xff]  }
  0x5d   :  { %v1673_v22 = vcombine.low %v328_v12, %v338_v20  ;;  %v347_v23 = vrot.slane %v346_v16, 4  ;;  %v674_v52 = vsel %vm2326_vm14, %v672_v44, %v673_v40  ;;  %v681_v62 = vsel %vm2326_vm14, %v679_v49, %v680_v50  ;;  %1921 = vmatprep.subr.bf16.mxu1 %v2031_v1  ;;  %v2039_v11 = vld [vmem:[#allocation8 + $0x58] sm:$0xff]   ;;  %v2040_v12 = vld [vmem:[#allocation8 + $0x8] sm:$0xff]   ;;  %v2041_v13 = vld [vmem:[#allocation8 + $0x50] sm:$0xff]  }
  0x5e   :  { %v356_v24 = vor.u32 %v355_v18, %v351_v17  ;;  %v1700_v55 = vcombine.low %v671_v51, %v674_v52  ;;  %v1701_v46 = vcombine.low %v678_v42, %v681_v62  ;;  %v686_v57 = vrot.slane %v684_v53, 4  ;;  %1922 = vmatpush3.bf16.msra.mxu1 %v2031_v1  ;;  %v2042_v32 = vld [vmem:[#allocation8] sm:$0xff]   ;;  %v2044_v14 = vld [vmem:[#allocation8 + $0x48] sm:$0xff]   ;;  %v2358_v16 = vld [vmem:[#allocation8 + $0xb8] sm:$0xff]  }
  0x5f   :  { %1904 = vmatpush3.bf16.msra.mxu0 %v2022_v54  ;;  %1869 = vmatprep.mubr.bf16.mxu0 %v1673_v22  ;;  %v352_v35 = vsel %vm2276_vm11, %v347_v23, %v351_v17  ;;  %v649_v54 = vld [vmem:[#allocation2 + $0x24] sm:$0xe]  ;;  %v687_v58 = vrot.slane %v2316_v5, 5  ;;  %v2035_v5 = vld [vmem:[#allocation8 + $0x68] sm:$0xff]  }
  0x60   :  { %1905 = vmatprep.subr.bf16.mxu0 %v2023_v15  ;;  %v357_v36 = vrot.slane %v356_v24, 4  ;;  %v1698_v56 = vrot.slane %v649_v54, 9  ;;  %1923 = vmatprep.subr.bf16.mxu1 %v2033_v3 }
  0x61   :  { %v688_v31 = vsel %vm2326_vm14, %v686_v57, %v687_v58 }
  0x62   :  { %v362_v38 = vsel %vm2276_vm11, %v357_v36, %v361_v25  ;;  %v685_v60 = vsel %vm2326_vm14, %v1698_v56, %v684_v53  ;;  %1924 = vmatpush3.bf16.msra.mxu1 %v2033_v3 }
  0x63   :  { %1906 = vmatpush3.bf16.msra.mxu0 %v2023_v15  ;;  %v1674_v21 = vcombine.low %v352_v35, %v362_v38  ;;  %v1702_v61 = vcombine.low %v685_v60, %v688_v31  ;;  %1925 = vmatprep.subr.bf16.mxu1 %v2035_v5  ;;  %v2046_v15 = vld [vmem:[#allocation8 + $0x40] sm:$0xff]  }
  0x64   :  { %1907 = vmatprep.subr.bf16.mxu0 %v2026_v26 }
  0x65   :  { %1870 = vmatmul.mubr.bf16.gmra.mxu0 %v1674_v21 }
  0x66   :  { %1913 = vmatprep.mubr.bf16.mxu0 %v1699_v28  ;;  %1926 = vmatpush3.bf16.msra.mxu1 %v2035_v5  ;;  %v2364_v28 = vld [vmem:[%s2483_s2] ss:$0 sm:$0xff] }
  0x67   :  { %1908 = vmatpush3.bf16.msra.mxu0 %v2026_v26  ;;  %1927 = vmatprep.subr.bf16.mxu1 %v2037_v7 }
  0x68   :  { %1909 = vmatprep.subr.bf16.mxu0 %v2027_v27 }
  0x6a   :  { %1928 = vmatpush3.bf16.msra.mxu1 %v2037_v7 }
  0x6b   :  { %1910 = vmatpush3.bf16.msra.mxu0 %v2027_v27  ;;  %1929 = vmatprep.subr.bf16.mxu1 %v2039_v11 }
  0x6c   :  { %1911 = vmatprep.subr.bf16.mxu0 %v2028_v48 }
  0x6e   :  { %1930 = vmatpush3.bf16.msra.mxu1 %v2039_v11 }
  0x6f   :  { %1912 = vmatpush3.bf16.msra.mxu0 %v2028_v48  ;;  %1931 = vmatprep.subr.bf16.mxu1 %v2041_v13 }
  0x70   :  { %1945 = vmatprep.subr.bf16.mxu0 %v2029_v63 }
  0x72   :  { %1914 = vmatmul.mubr.bf16.vlgmr.msra.gmra.mxu0 %v1700_v55  ;;  %1932 = vmatpush3.bf16.msra.mxu1 %v2041_v13 }
  0x73   :  { %1917 = vmatprep.mubr.bf16.mxu0 %v1701_v46  ;;  %1946 = vmatpush3.bf16.msra.mxu0 %v2029_v63 }
  0x74   :  { %1947 = vmatprep.subr.bf16.mxu0 %v2030_v0  ;;  %1933 = vmatprep.subr.bf16.mxu1 %v2044_v14 }
  0x76   :  { %1934 = vmatpush3.bf16.msra.mxu1 %v2044_v14 }
  0x77   :  { %1948 = vmatpush3.bf16.msra.mxu0 %v2030_v0  ;;  %1935 = vmatprep.subr.bf16.mxu1 %v2046_v15 }
  0x78   :  { %1949 = vmatprep.subr.bf16.mxu0 %v2032_v2 }
  0x7a   :  { %1918 = vmatmul.mubr.bf16.gmra.mxu0 %v1702_v61  ;;  %1936 = vmatpush3.bf16.msra.mxu1 %v2046_v15 }
  0x7b   :  { %1950 = vmatpush3.bf16.msra.mxu0 %v2032_v2  ;;  %1969 = vmatprep.subr.bf16.mxu1 %v2358_v16 }
  0x7c   :  { %1951 = vmatprep.subr.bf16.mxu0 %v2034_v4 }
  0x7f   :  { %1952 = vmatpush3.bf16.msra.mxu0 %v2034_v4 }
  0x80   :  { %1953 = vmatprep.subr.bf16.mxu0 %v2036_v6 }
  0x83   :  { %1954 = vmatpush3.bf16.msra.mxu0 %v2036_v6 }
  0x84   :  { %1955 = vmatprep.subr.bf16.mxu0 %v2038_v10 }
  0x87   :  { %1956 = vmatpush3.bf16.msra.mxu0 %v2038_v10  ;;  %v976_v10 = vld [vmem:[#allocation2 + $0xc] sm:$0xf] }
  0x88   :  { %1957 = vmatprep.subr.bf16.mxu0 %v2040_v12 }
  0x8b   :  { %1958 = vmatpush3.bf16.msra.mxu0 %v2040_v12 }
  0x8c   :  { %1959 = vmatprep.subr.bf16.mxu0 %v2042_v32 }
  0x8f   :  { %1960 = vmatpush3.bf16.msra.mxu0 %v2042_v32 }
 0x10a   :  { %v1891_v20 = vpop.f32.mrf.mxu1 }
 0x10c   :  { %v615_v23 = vpop.f32.mrf.mxu1 }
 0x10e   :  { %v1892_v26 = vpop.f32.mrf.mxu1 }
 0x110   :  { %v618_v9 = vpop.f32.mrf.mxu1 }
 0x112   :  { %v1867_v17 = vpop.f32.mrf.mxu0 }
 0x113   :  { %v624_v37 = vadd.f32 %v1891_v20, %v1867_v17 }
 0x114   :  { %v478_v18 = vpop.f32.mrf.mxu0 }
 0x115   :  { %v616_v39 = vadd.f32 %v615_v23, %v478_v18 }
 0x116   :  { %v1868_v22 = vpop.f32.mrf.mxu0 }
 0x117   :  { %v627_v40 = vadd.f32 %v1892_v26, %v1868_v22 }
 0x118   :  { %v481_v24 = vpop.f32.mrf.mxu0 }
 0x119   :  { %v619_v49 = vadd.f32 %v618_v9, %v481_v24 }
 0x11c   :  { %v1895_v35 = vpop.f32.mrf.mxu1 }
 0x11e   :  { %v631_v38 = vpop.f32.mrf.mxu1 }
 0x120   :  { %v1896_v43 = vpop.f32.mrf.mxu1 }
 0x122   :  { %v634_v42 = vpop.f32.mrf.mxu1 }
 0x125   :  { %v1871_v25 = vpop.f32.mrf.mxu0 }
 0x126   :  { %v640_v56 = vadd.f32 %v1895_v35, %v1871_v25  ;;  %v980_v35 = vld [vmem:[#allocation2 + $0x14] sm:$0x1] }
 0x127   :  { %v494_v33 = vpop.f32.mrf.mxu0 }
 0x128   :  { %v632_v58 = vadd.f32 %v631_v38, %v494_v33 }
 0x129   :  { %v1872_v34 = vpop.f32.mrf.mxu0 }
 0x12a   :  { %v643_v63 = vadd.f32 %v1896_v43, %v1872_v34 }
 0x12b   :  { %v497_v36 = vpop.f32.mrf.mxu0 }
 0x12c   :  { %v635_v0 = vadd.f32 %v634_v42, %v497_v36 }
 0x132   :  { %v1915_v27 = vpop.f32.mrf.mxu0 }
 0x133   :  { %v837_v21 = vadd.f32 %v1915_v27, %v624_v37 }
 0x134   :  { %v804_v29 = vpop.f32.mrf.mxu0 }
 0x135   :  { %v852_v44 = vadd.f32 %v2364_v28, %v837_v21  ;;  %v835_v48 = vadd.f32 %v804_v29, %v616_v39 }
 0x136   :  { %v1916_v45 = vpop.f32.mrf.mxu0 }
 0x137   :  { %v860_v50 = vmax.f32 %v852_v44, 0.0  ;;  %v850_v51 = vadd.f32 %v2364_v28, %v835_v48  ;;  %v838_v52 = vadd.f32 %v1916_v45, %v627_v40 }
 0x138   :  { %v807_v53 = vpop.f32.mrf.mxu0 }
 0x139   :  { %v1771_v62 = vpack.c.bf16 %v860_v50, %v860_v50  ;;  %v858_v54 = vmax.f32 %v850_v51, 0.0  ;;  %v853_v55 = vadd.f32 %v2364_v28, %v838_v52  ;;  %v836_v46 = vadd.f32 %v807_v53, %v619_v49  ;;  %v973_v52 = vld [vmem:[#allocation2 + $0x8] sm:$0x1] }
 0x13a   :  { %v1919_v57 = vpop.f32.mrf.mxu0 }
 0x13b   :  { %v908_v60 = vshrl.u32 %v1771_v62, 16  ;;  %v1769_v31 = vpack.c.bf16 %v858_v54, %v858_v54  ;;  %v861_v61 = vmax.f32 %v853_v55, 0.0  ;;  %v851_v1 = vadd.f32 %v2364_v28, %v836_v46  ;;  %v990_v46 = vld [vmem:[#allocation2 + $0x24] sm:$0xf] }
 0x13c   :  { %v841_v2 = vadd.f32 %v1919_v57, %v640_v56  ;;  %v820_v3 = vpop.f32.mrf.mxu0  ;;  %v911_v5 = vshll.u32 %v1771_v62, 16 }
 0x13d   :  { %v910_v4 = vrot.slane %v908_v60, 7  ;;  %v891_v6 = vshrl.u32 %v1769_v31, 16  ;;  %v1772_v7 = vpack.c.bf16 %v861_v61, %v861_v61  ;;  %v894_v11 = vshll.u32 %v1769_v31, 16 }
 0x13e   :  { %v859_v12 = vmax.f32 %v851_v1, 0.0  ;;  %v856_v13 = vadd.f32 %v2364_v28, %v841_v2  ;;  %v839_v32 = vadd.f32 %v820_v3, %v632_v58  ;;  %v1920_v14 = vpop.f32.mrf.mxu0 }
 0x13f   :  { %v913_v15 = vor.u32 %v911_v5, %v910_v4  ;;  %v914_v17 = vrot.slane %v910_v4, 4  ;;  %v893_v18 = vrot.slane %v891_v6, 7  ;;  %v916_v20 = vshrl.u32 %v1772_v7, 16  ;;  %v983_v4 = vld [vmem:[#allocation2 + $0x18] sm:$0xf] }
 0x140   :  { %v919_v22 = vshll.u32 %v1772_v7, 16  ;;  %v1770_v23 = vpack.c.bf16 %v859_v12, %v859_v12  ;;  %v864_v24 = vmax.f32 %v856_v13, 0.0  ;;  %v854_v25 = vadd.f32 %v2364_v28, %v839_v32  ;;  %v823_v39 = vpop.f32.mrf.mxu0 }
 0x141   :  { %v977_v26 = vsel %vm2219_vm8, %v913_v15, %v976_v10  ;;  %v896_v33 = vor.u32 %v894_v11, %v893_v18  ;;  %v897_v9 = vrot.slane %v893_v18, 4  ;;  %v918_v34 = vrot.slane %v916_v20, 7 }
 0x142   :  { %978 = vst [vmem:[#allocation2 + $0xc] sm:$0xf] %v977_v26  ;;  %v899_v36 = vshrl.u32 %v1770_v23, 16  ;;  %v902_v37 = vshll.u32 %v1770_v23, 16  ;;  %v1775_v38 = vpack.c.bf16 %v864_v24, %v864_v24  ;;  %v862_v27 = vmax.f32 %v854_v25, 0.0 }
 0x143   :  { %v970_v21 = vsel %vm2219_vm8, %v896_v33, %v2254_v30  ;;  %v921_v29 = vor.u32 %v919_v22, %v918_v34  ;;  %v923_v40 = vrot.slane %v918_v34, 4  ;;  %v842_v43 = vadd.f32 %v1920_v14, %v643_v63  ;;  %v994_v22 = vld [vmem:[#allocation2 + $0x2c] sm:$0x1] }
 0x144   :  { %971 = vst [vmem:[#allocation2] sm:$0xf] %v970_v21  ;;  %v901_v44 = vrot.slane %v899_v36, 7  ;;  %v942_v48 = vshrl.u32 %v1775_v38, 16  ;;  %v945_v45 = vshll.u32 %v1775_v38, 16  ;;  %v1773_v49 = vpack.c.bf16 %v862_v27, %v862_v27 }
 0x145   :  { %v922_v50 = vsel %vm2213_vm7, %v914_v17, %v921_v29  ;;  %v981_v51 = vsel %vm2194_vm3, %v923_v40, %v980_v35  ;;  %v857_v53 = vadd.f32 %v2364_v28, %v842_v43  ;;  %v840_v42 = vadd.f32 %v823_v39, %v635_v0  ;;  %v987_v40 = vld [vmem:[#allocation2 + $0x20] sm:$0x1] }
 0x146   :  { %979 = vst [vmem:[#allocation2 + $0x10] sm:$0xf] %v922_v50  ;;  %982 = vst [vmem:[#allocation2 + $0x14] sm:$0x1] %v981_v51  ;;  %v904_v30 = vor.u32 %v902_v37, %v901_v44  ;;  %v906_v62 = vrot.slane %v901_v44, 4  ;;  %v944_v54 = vrot.slane %v942_v48, 7 }
 0x147   :  { %v925_v55 = vshrl.u32 %v1773_v49, 16  ;;  %v865_v56 = vmax.f32 %v857_v53, 0.0  ;;  %v855_v57 = vadd.f32 %v2364_v28, %v840_v42  ;;  %v928_v63 = vshll.u32 %v1773_v49, 16 }
 0x148   :  { %v905_v58 = vsel %vm2213_vm7, %v897_v9, %v904_v30  ;;  %v974_v60 = vsel %vm2194_vm3, %v906_v62, %v973_v52  ;;  %v947_v31 = vor.u32 %v945_v45, %v944_v54  ;;  %v948_v11 = vrot.slane %v944_v54, 4 }
 0x149   :  { %972 = vst [vmem:[#allocation2 + $0x4] sm:$0xf] %v905_v58  ;;  %975 = vst [vmem:[#allocation2 + $0x8] sm:$0x1] %v974_v60  ;;  %v927_v61 = vrot.slane %v925_v55, 7  ;;  %v1776_v0 = vpack.c.bf16 %v865_v56, %v865_v56  ;;  %v863_v1 = vmax.f32 %v855_v57, 0.0 }
 0x14a   :  { %v999_v2 = vld [vmem:[#allocation2 + $0xc] sm:$0xf]  ;;  %v991_v3 = vsel %vm2219_vm8, %v947_v31, %v990_v46 }
 0x14b   :  { %v1050_v5 = vshrl.u32 %v999_v2, 16  ;;  %v1053_v28 = vshll.u32 %v999_v2, 16  ;;  %992 = vst [vmem:[#allocation2 + $0x24] sm:$0xf] %v991_v3  ;;  %v930_v6 = vor.u32 %v928_v63, %v927_v61  ;;  %v950_v7 = vshrl.u32 %v1776_v0, 16 }
 0x14c   :  { %v997_v10 = vld [vmem:[#allocation2] sm:$0xf]  ;;  %v1774_v12 = vpack.c.bf16 %v863_v1, %v863_v1  ;;  %v953_v17 = vshll.u32 %v1776_v0, 16  ;;  %v931_v33 = vrot.slane %v927_v61, 4 }
 0x14d   :  { %v1026_v13 = vshrl.u32 %v997_v10, 16  ;;  %v1029_v32 = vshll.u32 %v997_v10, 16  ;;  %v984_v14 = vsel %vm2219_vm8, %v930_v6, %v983_v4  ;;  %v952_v15 = vrot.slane %v950_v7, 7  ;;  %v2391_v18 = vld [vmem:[#allocation2 + $0x10] sm:$0xf] }
 0x14e   :  { %v1052_v20 = vrot.slane %v1050_v5, 4  ;;  %985 = vst [vmem:[#allocation2 + $0x18] sm:$0xf] %v984_v14  ;;  %v933_v23 = vshrl.u32 %v1774_v12, 16  ;;  %v1055_v26 = vrot.slane %v1053_v28, 5  ;;  %v936_v35 = vshll.u32 %v1774_v12, 16 }
 0x14f   :  { %v1028_v24 = vrot.slane %v1026_v13, 4  ;;  %v1031_v25 = vrot.slane %v1029_v32, 5  ;;  %v955_v9 = vor.u32 %v953_v17, %v952_v15  ;;  %v957_v34 = vrot.slane %v952_v15, 4  ;;  %v2412_v56 = vld [vmem:[#allocation2 + $0x14] sm:$0x1] }
 0x150   :  { %v935_v36 = vrot.slane %v933_v23, 7  ;;  %v2393_v37 = vld [vmem:[#allocation2 + $0x4] sm:$0xf]  ;;  %v1733_v47 = vcombine.low %v999_v2, %v2391_v18  ;;  %v2396_v38 = vld [vmem:[#allocation2 + $0x8] sm:$0x1]  ;;  %v1059_v39 = vshll.u32 %v2391_v18, 16  ;;  %v1056_v51 = vor.u32 %v1055_v26, %v1052_v20 }
 0x151   :  { %v1032_v27 = vor.u32 %v1031_v25, %v1028_v24  ;;  %v956_v21 = vsel %vm2213_vm7, %v948_v11, %v955_v9  ;;  %v995_v29 = vsel %vm2194_vm3, %v957_v34, %v994_v22  ;;  %v1039_v43 = vshrl.u32 %v2393_v37, 16 }
 0x152   :  { %v1732_v44 = vcombine.low %v997_v10, %v2393_v37  ;;  %993 = vst [vmem:[#allocation2 + $0x28] sm:$0xf] %v956_v21  ;;  %996 = vst [vmem:[#allocation2 + $0x2c] sm:$0x1] %v995_v29  ;;  %v938_v48 = vor.u32 %v936_v35, %v935_v36  ;;  %v940_v45 = vrot.slane %v935_v36, 4  ;;  %v1035_v49 = vshll.u32 %v2393_v37, 16 }
 0x153   :  { %v1003_v50 = vld [vmem:[#allocation2 + $0x24] sm:$0xf]  ;;  %v1063_v52 = vshrl.u32 %v2391_v18, 16  ;;  %v1041_v53 = vrot.slane %v1039_v43, 4  ;;  %v1045_v42 = vshll.u32 %v2396_v38, 16  ;;  %v1033_v58 = vrot.slane %v1032_v27, 4 }
 0x154   :  { %1961 = vmatprep.mubr.bf16.mxu0 %v1732_v44  ;;  %v1098_v30 = vshrl.u32 %v1003_v50, 16  ;;  %v939_v62 = vsel %vm2213_vm7, %v931_v33, %v938_v48  ;;  %v988_v54 = vsel %vm2194_vm3, %v940_v45, %v987_v40  ;;  %v1037_v55 = vrot.slane %v1035_v49, 5  ;;  %v2050_v27 = vld [vmem:[#allocation8 + $0xb0] sm:$0xff]  }
 0x155   :  { %1962 = vmatmul.mubr.bf16.vlgmr.msra.gmra.mxu0 %v1733_v47  ;;  %v1101_v46 = vshll.u32 %v1003_v50, 16  ;;  %986 = vst [vmem:[#allocation2 + $0x1c] sm:$0xf] %v939_v62  ;;  %989 = vst [vmem:[#allocation2 + $0x20] sm:$0x1] %v988_v54  ;;  %v1061_v60 = vrot.slane %v1059_v39, 5 }
 0x156   :  { %v1001_v57 = vld [vmem:[#allocation2 + $0x18] sm:$0xf]  ;;  %v1042_v63 = vor.u32 %v1041_v53, %v1037_v55  ;;  %v1057_v0 = vrot.slane %v1056_v51, 4  ;;  %v1047_v1 = vrot.slane %v1045_v42, 5  ;;  %v1100_v41 = vrot.slane %v1098_v30, 4 }
 0x157   :  { %v1074_v31 = vshrl.u32 %v1001_v57, 16  ;;  %v1077_v61 = vshll.u32 %v1001_v57, 16  ;;  %v1065_v2 = vrot.slane %v1063_v52, 4  ;;  %v1069_v8 = vshll.u32 %v2412_v56, 16  ;;  %v2051_v51 = vld [vmem:[#allocation8 + $0xa8] sm:$0xff]  }
 0x158   :  { %v1043_v5 = vrot.slane %v1042_v63, 4  ;;  %v1103_v28 = vrot.slane %v1101_v46, 5  ;;  %v1038_v10 = vsel %vm2276_vm11, %v1033_v58, %v1037_v55  ;;  %v1062_v22 = vsel %vm2276_vm11, %v1057_v0, %v1061_v60  ;;  %v1404_v30 = vld [vmem:[#allocation2] sm:$0xe]  ;;  %v2052_v63 = vld [vmem:[#allocation8 + $0xa0] sm:$0xff]  }
 0x159   :  { %v1076_v3 = vrot.slane %v1074_v31, 4  ;;  %v1079_v4 = vrot.slane %v1077_v61, 5  ;;  %v2415_v6 = vld [vmem:[#allocation2 + $0x28] sm:$0xf]  ;;  %v1066_v7 = vor.u32 %v1065_v2, %v1061_v60  ;;  %v1071_v14 = vrot.slane %v1069_v8, 5  ;;  %v2055_v2 = vld [vmem:[#allocation8 + $0x88] sm:$0xff]  }
 0x15a   :  { %v1048_v11 = vsel %vm2276_vm11, %v1043_v5, %v1047_v1  ;;  %v1111_v12 = vshrl.u32 %v2415_v6, 16  ;;  %v2422_v15 = vld [vmem:[#allocation2 + $0x2c] sm:$0x1]  ;;  %v1107_v17 = vshll.u32 %v2415_v6, 16  ;;  %v1104_v25 = vor.u32 %v1103_v28, %v1100_v41  ;;  %v2054_v41 = vld [vmem:[#allocation8 + $0x90] sm:$0xff]  }
 0x15b   :  { %v1720_v13 = vcombine.low %v1038_v10, %v1048_v11  ;;  %v1067_v32 = vrot.slane %v1066_v7, 4  ;;  %v1080_v24 = vor.u32 %v1079_v4, %v1076_v3  ;;  %v1735_v36 = vcombine.low %v1003_v50, %v2415_v6  ;;  %v2053_v1 = vld [vmem:[#allocation8 + $0x98] sm:$0xff]   ;;  %v2056_v3 = vld [vmem:[#allocation8 + $0x80] sm:$0xff]   ;;  %v1406_v10 = vld [vmem:[#allocation2 + $0x18] sm:$0xe] }
 0x15c   :  { %v2425_v20 = vld [vmem:[#allocation2 + $0x1c] sm:$0xf]  ;;  %v2429_v23 = vld [vmem:[#allocation2 + $0x20] sm:$0x1]  ;;  %v1113_v26 = vrot.slane %v1111_v12, 4  ;;  %v1109_v39 = vrot.slane %v1107_v17, 5 }
 0x15d   :  { %v1087_v33 = vshrl.u32 %v2425_v20, 16  ;;  %v1734_v9 = vcombine.low %v1001_v57, %v2425_v20  ;;  %1937 = vmatprep.mubr.bf16.mxu1 %v1720_v13  ;;  %v1072_v34 = vsel %vm2276_vm11, %v1067_v32, %v1071_v14  ;;  %v1083_v35 = vshll.u32 %v2425_v20, 16  ;;  %v1405_v5 = vld [vmem:[#allocation2 + $0xc] sm:$0xe] }
 0x15e   :  { %v1721_v47 = vcombine.low %v1062_v22, %v1072_v34  ;;  %v1117_v21 = vshll.u32 %v2422_v15, 16  ;;  %v1093_v43 = vshll.u32 %v2429_v23, 16  ;;  %v1418_v44 = vrot.slane %v2393_v37, 5 }
 0x15f   :  { %1965 = vmatprep.mubr.bf16.mxu0 %v1734_v9  ;;  %v1085_v29 = vrot.slane %v1083_v35, 5  ;;  %v1089_v40 = vrot.slane %v1087_v33, 4  ;;  %v1114_v48 = vor.u32 %v1113_v26, %v1109_v39  ;;  %v1081_v45 = vrot.slane %v1080_v24, 4  ;;  %v1407_v24 = vld [vmem:[#allocation2 + $0x24] sm:$0xe] }
 0x160   :  { %1966 = vmatmul.mubr.bf16.gmra.mxu0 %v1735_v36  ;;  %1938 = vmatmul.mubr.bf16.vlgmr.msra.gmra.mxu1 %v1721_v47  ;;  %v1420_v50 = vrot.slane %v1418_v44, 4  ;;  %v1105_v52 = vrot.slane %v1104_v25, 4  ;;  %v1119_v42 = vrot.slane %v1117_v21, 5  ;;  %v1095_v54 = vrot.slane %v1093_v43, 5 }
 0x161   :  { %1970 = vmatpush3.bf16.msra.mxu1 %v2358_v16  ;;  %v1090_v49 = vor.u32 %v1089_v40, %v1085_v29  ;;  %v1115_v53 = vrot.slane %v1114_v48, 4  ;;  %v1421_v55 = vrot.slane %v2396_v38, 5  ;;  %v1086_v16 = vsel %vm2276_vm11, %v1081_v45, %v1085_v29 }
 0x162   :  { %1971 = vmatprep.subr.bf16.mxu1 %v2050_v27  ;;  %v1744_v57 = vrot.slane %v1404_v30, 9  ;;  %v1110_v31 = vsel %vm2276_vm11, %v1105_v52, %v1109_v39  ;;  %v1425_v59 = vrot.slane %v2391_v18, 5  ;;  %v1432_v8 = vrot.slane %v2425_v20, 5  ;;  %v1615_v52 = vld [vmem:[#allocation3 + $0x10] sm:$0xff] }
 0x163   :  { %v1091_v62 = vrot.slane %v1090_v49, 4  ;;  %v1120_v37 = vsel %vm2276_vm11, %v1115_v53, %v1119_v42  ;;  %v1422_v58 = vsel %vm2326_vm14, %v1420_v50, %v1421_v55  ;;  %v1428_v7 = vrot.slane %v2412_v56, 5  ;;  %v1613_v55 = vld [vmem:[#allocation3] sm:$0xff] }
 0x164   :  { %v1723_v38 = vcombine.low %v1110_v31, %v1120_v37  ;;  %v1419_v61 = vsel %vm2326_vm14, %v1744_v57, %v1418_v44  ;;  %v1427_v4 = vrot.slane %v1425_v59, 4  ;;  %v1434_v28 = vrot.slane %v1432_v8, 4  ;;  %v1616_v31 = vld [vmem:[#allocation3 + $0x18] sm:$0xff] }
 0x165   :  { %1972 = vmatpush3.bf16.msra.mxu1 %v2050_v27  ;;  %v1096_v46 = vsel %vm2276_vm11, %v1091_v62, %v1095_v54  ;;  %v1748_v0 = vcombine.low %v1419_v61, %v1422_v58  ;;  %v1435_v11 = vrot.slane %v2429_v23, 5  ;;  %v1745_v12 = vrot.slane %v1405_v5, 9 }
 0x166   :  { %v1722_v60 = vcombine.low %v1086_v16, %v1096_v46  ;;  %1973 = vmatprep.subr.bf16.mxu1 %v2051_v51  ;;  %v1429_v13 = vsel %vm2326_vm14, %v1427_v4, %v1428_v7  ;;  %v1439_v18 = vrot.slane %v2415_v6, 5  ;;  %v1746_v32 = vrot.slane %v1406_v10, 9  ;;  %v1619_v10 = vld [vmem:[#allocation3 + $0x30] sm:$0xff] }
 0x167   :  { %v1436_v14 = vsel %vm2326_vm14, %v1434_v28, %v1435_v11  ;;  %v1426_v17 = vsel %vm2326_vm14, %v1745_v12, %v1425_v59  ;;  %v1442_v25 = vrot.slane %v2422_v15, 5  ;;  %v1747_v6 = vrot.slane %v1407_v24, 9  ;;  %v1614_v59 = vld [vmem:[#allocation3 + $0x8] sm:$0xff] }
 0x168   :  { %1941 = vmatprep.mubr.bf16.mxu1 %v1722_v60  ;;  %v1749_v20 = vcombine.low %v1426_v17, %v1429_v13  ;;  %v1433_v56 = vsel %vm2326_vm14, %v1746_v32, %v1432_v8  ;;  %v1441_v23 = vrot.slane %v1439_v18, 4 }
 0x169   :  { %1942 = vmatmul.mubr.bf16.gmra.mxu1 %v1723_v38  ;;  %v1750_v22 = vcombine.low %v1433_v56, %v1436_v14  ;;  %v1440_v33 = vsel %vm2326_vm14, %v1747_v6, %v1439_v18  ;;  %v1620_v6 = vld [vmem:[#allocation3 + $0x38] sm:$0xff] }
 0x16a   :  { %1974 = vmatpush3.bf16.msra.mxu1 %v2051_v51  ;;  %1985 = vmatprep.mubr.bf16.mxu1 %v1748_v0  ;;  %v1443_v26 = vsel %vm2326_vm14, %v1441_v23, %v1442_v25 }
 0x16b   :  { %1975 = vmatprep.subr.bf16.mxu1 %v2052_v63  ;;  %v1751_v9 = vcombine.low %v1440_v33, %v1443_v26 }
 0x16e   :  { %1976 = vmatpush3.bf16.msra.mxu1 %v2052_v63 }
 0x16f   :  { %1977 = vmatprep.subr.bf16.mxu1 %v2053_v1 }
 0x172   :  { %1978 = vmatpush3.bf16.msra.mxu1 %v2053_v1 }
 0x173   :  { %1979 = vmatprep.subr.bf16.mxu1 %v2054_v41 }
 0x176   :  { %1980 = vmatpush3.bf16.msra.mxu1 %v2054_v41 }
 0x177   :  { %1981 = vmatprep.subr.bf16.mxu1 %v2055_v2 }
 0x17a   :  { %1982 = vmatpush3.bf16.msra.mxu1 %v2055_v2 }
 0x17b   :  { %1983 = vmatprep.subr.bf16.mxu1 %v2056_v3 }
 0x17e   :  { %1984 = vmatpush3.bf16.msra.mxu1 %v2056_v3 }
 0x181   :  { %1986 = vmatmul.mubr.bf16.vlgmr.msra.gmra.mxu1 %v1749_v20  ;;  %v1617_v20 = vld [vmem:[#allocation3 + $0x20] sm:$0xff] }
 0x182   :  { %1989 = vmatprep.mubr.bf16.mxu1 %v1750_v22 }
 0x189   :  { %1990 = vmatmul.mubr.bf16.gmra.mxu1 %v1751_v9 }
 0x215   :  { %v1963_v27 = vpop.f32.mrf.mxu0 }
 0x217   :  { %v1373_v21 = vpop.f32.mrf.mxu0 }
 0x219   :  { %v1964_v40 = vpop.f32.mrf.mxu0 }
 0x21b   :  { %v1376_v15 = vpop.f32.mrf.mxu0 }
 0x220   :  { %v1939_v34 = vpop.f32.mrf.mxu1  ;;  %v1967_v48 = vpop.f32.mrf.mxu0 }
 0x221   :  { %v1382_v45 = vadd.f32 %v1963_v27, %v1939_v34 }
 0x222   :  { %v1236_v35 = vpop.f32.mrf.mxu1  ;;  %v1389_v42 = vpop.f32.mrf.mxu0 }
 0x223   :  { %v1374_v50 = vadd.f32 %v1373_v21, %v1236_v35 }
 0x224   :  { %v1940_v36 = vpop.f32.mrf.mxu1  ;;  %v1968_v61 = vpop.f32.mrf.mxu0 }
 0x225   :  { %v1385_v30 = vadd.f32 %v1964_v40, %v1940_v36  ;;  %v1618_v36 = vld [vmem:[#allocation3 + $0x28] sm:$0xff] }
 0x226   :  { %v1239_v47 = vpop.f32.mrf.mxu1  ;;  %v1392_v12 = vpop.f32.mrf.mxu0 }
 0x227   :  { %v1377_v16 = vadd.f32 %v1376_v15, %v1239_v47 }
 0x229   :  { %v1943_v39 = vpop.f32.mrf.mxu1 }
 0x22a   :  { %v1398_v60 = vadd.f32 %v1967_v48, %v1943_v39 }
 0x22b   :  { %v1252_v29 = vpop.f32.mrf.mxu1 }
 0x22c   :  { %v1390_v2 = vadd.f32 %v1389_v42, %v1252_v29 }
 0x22d   :  { %v1944_v43 = vpop.f32.mrf.mxu1 }
 0x22e   :  { %v1401_v7 = vadd.f32 %v1968_v61, %v1944_v43 }
 0x22f   :  { %v1255_v44 = vpop.f32.mrf.mxu1 }
 0x230   :  { %v1393_v17 = vadd.f32 %v1392_v12, %v1255_v44 }
 0x241   :  { %v1987_v49 = vpop.f32.mrf.mxu1 }
 0x242   :  { %v1592_v51 = vadd.f32 %v1987_v49, %v1382_v45 }
 0x243   :  { %v1559_v53 = vpop.f32.mrf.mxu1 }
 0x244   :  { %v1607_v62 = vadd.f32 %v1760_v19, %v1592_v51  ;;  %v1590_v54 = vadd.f32 %v1559_v53, %v1374_v50 }
 0x245   :  { %v1988_v37 = vpop.f32.mrf.mxu1 }
 0x246   :  { %v1623_v46 = vadd.f32 %v1615_v52, %v1607_v62  ;;  %v1605_v57 = vadd.f32 %v1760_v19, %v1590_v54  ;;  %v1593_v58 = vadd.f32 %v1988_v37, %v1385_v30 }
 0x247   :  { %v1562_v38 = vpop.f32.mrf.mxu1 }
 0x248   :  { %v1631_v63 = vmax.f32 %v1623_v46, 0.0  ;;  %v1621_v0 = vadd.f32 %v1613_v55, %v1605_v57  ;;  %v1608_v1 = vadd.f32 %v1760_v19, %v1593_v58  ;;  %v1591_v41 = vadd.f32 %v1562_v38, %v1377_v16 }
 0x249   :  { %v1991_v8 = vpop.f32.mrf.mxu1 }
 0x24a   :  { %1639 = vst [vmem:[#allocation9 + $0x10] sm:$0xff] %v1631_v63  ;;  %v1629_v3 = vmax.f32 %v1621_v0, 0.0  ;;  %v1624_v4 = vadd.f32 %v1616_v31, %v1608_v1  ;;  %v1606_v5 = vadd.f32 %v1760_v19, %v1591_v41  ;;  %v1596_v28 = vadd.f32 %v1991_v8, %v1398_v60 }
 0x24b   :  { %v1575_v11 = vpop.f32.mrf.mxu1 }
 0x24c   :  { %1637 = vst [vmem:[#allocation9] sm:$0xff] %v1629_v3  ;;  %v1632_v13 = vmax.f32 %v1624_v4, 0.0  ;;  %v1622_v18 = vadd.f32 %v1614_v59, %v1606_v5  ;;  %v1611_v32 = vadd.f32 %v1760_v19, %v1596_v28  ;;  %v1594_v14 = vadd.f32 %v1575_v11, %v1390_v2 }
 0x24d   :  { %v1992_v56 = vpop.f32.mrf.mxu1 }
 0x24e   :  { %1640 = vst [vmem:[#allocation9 + $0x18] sm:$0xff] %v1632_v13  ;;  %v1630_v22 = vmax.f32 %v1622_v18, 0.0  ;;  %v1627_v23 = vadd.f32 %v1619_v10, %v1611_v32  ;;  %v1609_v24 = vadd.f32 %v1760_v19, %v1594_v14  ;;  %v1597_v25 = vadd.f32 %v1992_v56, %v1401_v7 }
 0x24f   :  { %v1578_v26 = vpop.f32.mrf.mxu1 }
 0x250   :  { %1638 = vst [vmem:[#allocation9 + $0x8] sm:$0xff] %v1630_v22  ;;  %v1635_v33 = vmax.f32 %v1627_v23, 0.0  ;;  %v1625_v9 = vadd.f32 %v1617_v20, %v1609_v24  ;;  %v1612_v34 = vadd.f32 %v1760_v19, %v1597_v25  ;;  %v1595_v35 = vadd.f32 %v1578_v26, %v1393_v17 }
 0x252   :  { %1643 = vst [vmem:[#allocation9 + $0x30] sm:$0xff] %v1635_v33  ;;  %v1633_v47 = vmax.f32 %v1625_v9, 0.0  ;;  %v1628_v27 = vadd.f32 %v1620_v6, %v1612_v34  ;;  %v1610_v39 = vadd.f32 %v1760_v19, %v1595_v35 }
 0x254   :  { %1641 = vst [vmem:[#allocation9 + $0x20] sm:$0xff] %v1633_v47  ;;  %v1636_v21 = vmax.f32 %v1628_v27, 0.0  ;;  %v1626_v29 = vadd.f32 %v1618_v36, %v1610_v39 }
 0x256   :  { %1644 = vst [vmem:[#allocation9 + $0x38] sm:$0xff] %v1636_v21  ;;  %v1634_v40 = vmax.f32 %v1626_v29, 0.0 }
 0x258   :  { %1642 = vst [vmem:[#allocation9 + $0x28] sm:$0xff] %v1634_v40 }
 0x259   :  { %2128 = shalt.err (!%p2125_p5)
}
 0x25a   :  { %1656 = dma.vmem_to_hbm [thread:$0]  %s1651_s12, 1024, %s2486_s5, [#allocation5], %s2147_s28, %s2147_s28, %s2148_s29  }
 0x25b   :  { %2141 = dma.done.wait [#allocation5], 1024  }
 0x25c   :  { %2142 = vsyncadd [#allocation5], 4294966272 }
 0x25d   :  { %1660 = vsyncpa [#allocation4], 1 }
 0x25e   :  { %1661 = vsyncpa [#allocation7], 1 }
 0x25f   :  { %1662 = vsyncpa [#allocation5], 1 }

</bundles_post_ra>
